<compile_context>
chip_gen: v5e
topology: v5e:2x2
jax: 0.10.0
libtpu: 0.0.40
codegen_flags: <defaults>
</compile_context>

<pallas_src>
import jax
import jax.numpy as jnp
from jax.experimental import pallas as pl
from jax.experimental.pallas import tpu as pltpu


def _round_up(x, m):
    return ((x + m - 1) // m) * m


def _grid_loss_kernel(theta_ref, theta_gt_ref, p_ref, out_ref):
    # theta_ref / theta_gt_ref : (6, bt)  lane-dense batch tile for this core/step
    # p_ref                    : (3, Np)  resident [X; Y; 1], zero-padded columns
    # out_ref                  : (1, 1, 1) per-core partial sum (resident over i)
    i = pl.program_id(1)

    @pl.when(i == 0)
    def _init():
        out_ref[...] = jnp.zeros_like(out_ref)

    # 3x3 Gram coefficients of P_ext over the (zero-padded) lanes — exact
    # without masking because padded columns are zero in every row (g22 = N).
    x = p_ref[0:1, :]
    y = p_ref[1:2, :]
    o = p_ref[2:3, :]
    g00 = jnp.sum(x * x, axis=-1, keepdims=True)   # sum X^2
    g01 = jnp.sum(x * y, axis=-1, keepdims=True)   # sum X*Y
    g02 = jnp.sum(x * o, axis=-1, keepdims=True)   # sum X
    g11 = jnp.sum(y * y, axis=-1, keepdims=True)   # sum Y^2
    g12 = jnp.sum(y * o, axis=-1, keepdims=True)   # sum Y
    g22 = jnp.sum(o * o, axis=-1, keepdims=True)   # N

    # Delta-affine fold; padded batch lanes are zero -> zero contribution.
    d = theta_ref[...] - theta_gt_ref[...]          # (6, bt)
    d0, d1, d2 = d[0:1, :], d[1:2, :], d[2:3, :]
    d3, d4, d5 = d[3:4, :], d[4:5, :], d[5:6, :]

    # Per-batch-row quadratic form d_x G d_x^T + d_y G d_y^T, lane-dense.
    q = (g00 * (d0 * d0 + d3 * d3)
         + g11 * (d1 * d1 + d4 * d4)
         + g22 * (d2 * d2 + d5 * d5)
         + 2.0 * (g01 * (d0 * d1 + d3 * d4)
                  + g02 * (d0 * d2 + d3 * d5)
                  + g12 * (d1 * d2 + d4 * d5)))     # (1, bt)

    out_ref[...] += jnp.sum(q, axis=-1, keepdims=True)[None]   # (1, 1, 1)


def transformed_grid_loss(theta, theta_gt, P, *, lane_tile=4096):
    theta = theta.astype(jnp.float32)
    theta_gt = theta_gt.astype(jnp.float32)
    P = P.astype(jnp.float32)

    B = theta.shape[0]
    N = P.shape[1]

    Np = _round_up(N, 128)
    half = -(-B // 2)                                   # rows per TensorCore
    half_p = _round_up(half, 128)                       # lane-aligned
    bt = min(_round_up(lane_tile, 128), half_p)         # lanes per grid step
    T = -(-half_p // bt)                                # arbitrary-axis steps
    Bh = T * bt                                         # padded rows per core
    Bp = 2 * Bh

    # Lane-dense (6, Bp) layout: batch along lanes.  Zero padding is exact.
    theta_t = jnp.pad(theta.T, ((0, 0), (0, Bp - B)))
    theta_gt_t = jnp.pad(theta_gt.T, ((0, 0), (0, Bp - B)))

    # P_ext = [X; Y; 1], zero-padded columns (exact Gram sums).
    ones = jnp.ones((1, N), jnp.float32)
    p_ext = jnp.pad(jnp.concatenate([P, ones], axis=0), ((0, 0), (0, Np - N)))

    partial = pl.pallas_call(
        _grid_loss_kernel,
        out_shape=jax.ShapeDtypeStruct((2, 1, 1), jnp.float32),
        grid_spec=pltpu.PrefetchScalarGridSpec(
            num_scalar_prefetch=0,
            grid=(2, T),                                # (core split, batch tiles)
            in_specs=[
                pl.BlockSpec((6, bt), lambda c, i: (0, c * T + i)),   # theta
                pl.BlockSpec((6, bt), lambda c, i: (0, c * T + i)),   # theta_GT
                pl.BlockSpec((3, Np), lambda c, i: (0, 0)),           # P_ext resident
            ],
            out_specs=pl.BlockSpec((1, 1, 1), lambda c, i: (c, 0, 0)),
        ),
        compiler_params=pltpu.CompilerParams(
            dimension_semantics=("parallel", "arbitrary")),
    )(theta_t, theta_gt_t, p_ext)

    return jnp.sum(partial) / jnp.float32(B * N)


def reference_loss(theta, theta_gt, P):
    # Pure-JAX reference mirroring the PyTorch forward (affine branch).
    B = theta.shape[0]
    A = theta.reshape(B, 2, 3)
    Ag = theta_gt.reshape(B, 2, 3)
    Pp = jnp.einsum("bij,jn->bin", A[:, :, :2], P) + A[:, :, 2:3]
    Pg = jnp.einsum("bij,jn->bin", Ag[:, :, :2], P) + Ag[:, :, 2:3]
    return jnp.mean(jnp.sum((Pp - Pg) ** 2, axis=1))


if __name__ == "__main__":
    B = 2
    grid_size = 20            # module default; N=400 exercises the lane-pad path
    N = grid_size * grid_size

    key = jax.random.PRNGKey(0)
    k1, k2 = jax.random.split(key)
    identity = jnp.array([1.0, 0.0, 0.0, 0.0, 1.0, 0.0], jnp.float32)
    theta = identity[None, :] + 0.1 * jax.random.normal(k1, (B, 6), jnp.float32)
    theta_gt = identity[None, :] + 0.1 * jax.random.normal(k2, (B, 6), jnp.float32)

    # self.P from __init__: meshgrid of linspace(-1,1,grid_size), flattened, (2,N)
    axis_coords = jnp.linspace(-1.0, 1.0, grid_size)
    X, Y = jnp.meshgrid(axis_coords, axis_coords)
    P = jnp.stack([X.reshape(-1), Y.reshape(-1)], axis=0).astype(jnp.float32)

    loss = transformed_grid_loss(theta, theta_gt, P)
    jax.block_until_ready(loss)

    ref = reference_loss(theta, theta_gt, P)
    # Gram form reorders the f32 summation vs. the direct form; tolerance reflects that.
    assert jnp.allclose(loss, ref, rtol=1e-4, atol=1e-6), (loss, ref)
    print("KERNEL_OK")
</pallas_src>

<mosaic_0001>
module attributes {stable_mosaic.version = 11 : i64} {
  func.func @_grid_loss_kernel(%arg0: i32, %arg1: i32, %arg2: memref<6x128xf32, #tpu.memory_space<vmem>>, %arg3: memref<6x128xf32, #tpu.memory_space<vmem>>, %arg4: memref<3x512xf32, #tpu.memory_space<vmem>>, %arg5: memref<1x1x1xf32, #tpu.memory_space<vmem>>) attributes {dimension_semantics = [#tpu.dimension_semantics<parallel>, #tpu.dimension_semantics<arbitrary>], iteration_bounds = array<i64: 2, 1>, scalar_prefetch = 0 : i64, scratch_operands = 0 : i64, tpu.core_type = #tpu.core_type<tc>, window_params = [{transform_indices = @transform_0, window_bounds = array<i64: 6, 128>}, {transform_indices = @transform_1, window_bounds = array<i64: 6, 128>}, {pipeline_mode = #tpu.pipeline_mode<synchronous>, transform_indices = @transform_2, window_bounds = array<i64: 3, 512>}, {transform_indices = @transform_3, window_bounds = array<i64: 1, 1, 1>}]} {
    %c0_i32 = arith.constant 0 : i32
    %0 = arith.cmpi eq, %arg1, %c0_i32 : i32
    %1 = arith.extui %0 : i1 to i32
    %c0_i32_0 = arith.constant 0 : i32
    %2 = arith.cmpi ne, %1, %c0_i32_0 : i32
    scf.if %2 {
      %cst_21 = arith.constant 0.000000e+00 : f32
      %76 = vector.broadcast %cst_21 : f32 to vector<1x1x1xf32>
      %c0_22 = arith.constant 0 : index
      %c0_23 = arith.constant 0 : index
      %c0_24 = arith.constant 0 : index
      %77 = vector.load %arg5[%c0_22, %c0_23, %c0_24] : memref<1x1x1xf32, #tpu.memory_space<vmem>>, vector<1x1x1xf32>
      tpu.vector_store %arg5[%c0_22, %c0_23, %c0_24], %76 {strides = array<i32>} : memref<1x1x1xf32, #tpu.memory_space<vmem>>, vector<1x1x1xf32>,
    } else {
    }
    %c0 = arith.constant 0 : index
    %c0_1 = arith.constant 0 : index
    %3 = vector.load %arg4[%c0, %c0_1] : memref<3x512xf32, #tpu.memory_space<vmem>>, vector<1x512xf32>
    %c1 = arith.constant 1 : index
    %c0_2 = arith.constant 0 : index
    %4 = vector.load %arg4[%c1, %c0_2] : memref<3x512xf32, #tpu.memory_space<vmem>>, vector<1x512xf32>
    %c2 = arith.constant 2 : index
    %c0_3 = arith.constant 0 : index
    %5 = vector.load %arg4[%c2, %c0_3] : memref<3x512xf32, #tpu.memory_space<vmem>>, vector<1x512xf32>
    %6 = arith.mulf %3, %3 : vector<1x512xf32>
    %cst = arith.constant dense<0.000000e+00> : vector<1xf32>
    %7 = vector.multi_reduction <add>, %6, %cst [1] : vector<1x512xf32> to vector<1xf32>
    %8 = vector.shape_cast %7 : vector<1xf32> to vector<1x1xf32>
    %9 = arith.mulf %3, %4 : vector<1x512xf32>
    %cst_4 = arith.constant dense<0.000000e+00> : vector<1xf32>
    %10 = vector.multi_reduction <add>, %9, %cst_4 [1] : vector<1x512xf32> to vector<1xf32>
    %11 = vector.shape_cast %10 : vector<1xf32> to vector<1x1xf32>
    %12 = arith.mulf %3, %5 : vector<1x512xf32>
    %cst_5 = arith.constant dense<0.000000e+00> : vector<1xf32>
    %13 = vector.multi_reduction <add>, %12, %cst_5 [1] : vector<1x512xf32> to vector<1xf32>
    %14 = vector.shape_cast %13 : vector<1xf32> to vector<1x1xf32>
    %15 = arith.mulf %4, %4 : vector<1x512xf32>
    %cst_6 = arith.constant dense<0.000000e+00> : vector<1xf32>
    %16 = vector.multi_reduction <add>, %15, %cst_6 [1] : vector<1x512xf32> to vector<1xf32>
    %17 = vector.shape_cast %16 : vector<1xf32> to vector<1x1xf32>
    %18 = arith.mulf %4, %5 : vector<1x512xf32>
    %cst_7 = arith.constant dense<0.000000e+00> : vector<1xf32>
    %19 = vector.multi_reduction <add>, %18, %cst_7 [1] : vector<1x512xf32> to vector<1xf32>
    %20 = vector.shape_cast %19 : vector<1xf32> to vector<1x1xf32>
    %21 = arith.mulf %5, %5 : vector<1x512xf32>
    %cst_8 = arith.constant dense<0.000000e+00> : vector<1xf32>
    %22 = vector.multi_reduction <add>, %21, %cst_8 [1] : vector<1x512xf32> to vector<1xf32>
    %23 = vector.shape_cast %22 : vector<1xf32> to vector<1x1xf32>
    %c0_9 = arith.constant 0 : index
    %c0_10 = arith.constant 0 : index
    %24 = vector.load %arg2[%c0_9, %c0_10] : memref<6x128xf32, #tpu.memory_space<vmem>>, vector<6x128xf32>
    %c0_11 = arith.constant 0 : index
    %c0_12 = arith.constant 0 : index
    %25 = vector.load %arg3[%c0_11, %c0_12] : memref<6x128xf32, #tpu.memory_space<vmem>>, vector<6x128xf32>
    %26 = arith.subf %24, %25 : vector<6x128xf32>
    %27 = vector.extract_strided_slice %26 {offsets = [0, 0], sizes = [1, 128], strides = [1, 1]} : vector<6x128xf32> to vector<1x128xf32>
    %28 = vector.extract_strided_slice %26 {offsets = [1, 0], sizes = [1, 128], strides = [1, 1]} : vector<6x128xf32> to vector<1x128xf32>
    %29 = vector.extract_strided_slice %26 {offsets = [2, 0], sizes = [1, 128], strides = [1, 1]} : vector<6x128xf32> to vector<1x128xf32>
    %30 = vector.extract_strided_slice %26 {offsets = [3, 0], sizes = [1, 128], strides = [1, 1]} : vector<6x128xf32> to vector<1x128xf32>
    %31 = vector.extract_strided_slice %26 {offsets = [4, 0], sizes = [1, 128], strides = [1, 1]} : vector<6x128xf32> to vector<1x128xf32>
    %32 = vector.extract_strided_slice %26 {offsets = [5, 0], sizes = [1, 128], strides = [1, 1]} : vector<6x128xf32> to vector<1x128xf32>
    %33 = arith.mulf %27, %27 : vector<1x128xf32>
    %34 = arith.mulf %30, %30 : vector<1x128xf32>
    %35 = arith.addf %33, %34 : vector<1x128xf32>
    %36 = vector.broadcast %8 : vector<1x1xf32> to vector<1x128xf32>
    %37 = arith.mulf %36, %35 : vector<1x128xf32>
    %38 = arith.mulf %28, %28 : vector<1x128xf32>
    %39 = arith.mulf %31, %31 : vector<1x128xf32>
    %40 = arith.addf %38, %39 : vector<1x128xf32>
    %41 = vector.broadcast %17 : vector<1x1xf32> to vector<1x128xf32>
    %42 = arith.mulf %41, %40 : vector<1x128xf32>
    %43 = arith.addf %37, %42 : vector<1x128xf32>
    %44 = arith.mulf %29, %29 : vector<1x128xf32>
    %45 = arith.mulf %32, %32 : vector<1x128xf32>
    %46 = arith.addf %44, %45 : vector<1x128xf32>
    %47 = vector.broadcast %23 : vector<1x1xf32> to vector<1x128xf32>
    %48 = arith.mulf %47, %46 : vector<1x128xf32>
    %49 = arith.addf %43, %48 : vector<1x128xf32>
    %50 = arith.mulf %27, %28 : vector<1x128xf32>
    %51 = arith.mulf %30, %31 : vector<1x128xf32>
    %52 = arith.addf %50, %51 : vector<1x128xf32>
    %53 = vector.broadcast %11 : vector<1x1xf32> to vector<1x128xf32>
    %54 = arith.mulf %53, %52 : vector<1x128xf32>
    %55 = arith.mulf %27, %29 : vector<1x128xf32>
    %56 = arith.mulf %30, %32 : vector<1x128xf32>
    %57 = arith.addf %55, %56 : vector<1x128xf32>
    %58 = vector.broadcast %14 : vector<1x1xf32> to vector<1x128xf32>
    %59 = arith.mulf %58, %57 : vector<1x128xf32>
    %60 = arith.addf %54, %59 : vector<1x128xf32>
    %61 = arith.mulf %28, %29 : vector<1x128xf32>
    %62 = arith.mulf %31, %32 : vector<1x128xf32>
    %63 = arith.addf %61, %62 : vector<1x128xf32>
    %64 = vector.broadcast %20 : vector<1x1xf32> to vector<1x128xf32>
    %65 = arith.mulf %64, %63 : vector<1x128xf32>
    %66 = arith.addf %60, %65 : vector<1x128xf32>
    %cst_13 = arith.constant 2.000000e+00 : f32
    %67 = vector.broadcast %cst_13 : f32 to vector<1x128xf32>
    %68 = arith.mulf %67, %66 : vector<1x128xf32>
    %69 = arith.addf %49, %68 : vector<1x128xf32>
    %c0_14 = arith.constant 0 : index
    %c0_15 = arith.constant 0 : index
    %c0_16 = arith.constant 0 : index
    %70 = vector.load %arg5[%c0_14, %c0_15, %c0_16] : memref<1x1x1xf32, #tpu.memory_space<vmem>>, vector<1x1x1xf32>
    %cst_17 = arith.constant dense<0.000000e+00> : vector<1xf32>
    %71 = vector.multi_reduction <add>, %69, %cst_17 [1] : vector<1x128xf32> to vector<1xf32>
    %72 = vector.shape_cast %71 : vector<1xf32> to vector<1x1xf32>
    %73 = vector.shape_cast %72 : vector<1x1xf32> to vector<1x1x1xf32>
    %74 = arith.addf %70, %73 : vector<1x1x1xf32>
    %c0_18 = arith.constant 0 : index
    %c0_19 = arith.constant 0 : index
    %c0_20 = arith.constant 0 : index
    %75 = vector.load %arg5[%c0_18, %c0_19, %c0_20] : memref<1x1x1xf32, #tpu.memory_space<vmem>>, vector<1x1x1xf32>
    tpu.vector_store %arg5[%c0_18, %c0_19, %c0_20], %74 {strides = array<i32>} : memref<1x1x1xf32, #tpu.memory_space<vmem>>, vector<1x1x1xf32>,
    return
  }
  func.func @transform_0(%arg0: i32, %arg1: i32) -> (i32, i32) {
    %c1_i32 = arith.constant 1 : i32
    %0 = arith.muli %arg0, %c1_i32 : i32
    %1 = arith.addi %0, %arg1 : i32
    %c0_i32 = arith.constant 0 : i32
    %c0_i32_0 = arith.constant 0 : i32
    return %c0_i32, %1 : i32, i32
  }
  func.func @transform_1(%arg0: i32, %arg1: i32) -> (i32, i32) {
    %c1_i32 = arith.constant 1 : i32
    %0 = arith.muli %arg0, %c1_i32 : i32
    %1 = arith.addi %0, %arg1 : i32
    %c0_i32 = arith.constant 0 : i32
    %c0_i32_0 = arith.constant 0 : i32
    return %c0_i32, %1 : i32, i32
  }
  func.func @transform_2(%arg0: i32, %arg1: i32) -> (i32, i32) {
    %c0_i32 = arith.constant 0 : i32
    %c0_i32_0 = arith.constant 0 : i32
    %c0_i32_1 = arith.constant 0 : i32
    return %c0_i32, %c0_i32_0 : i32, i32
  }
  func.func @transform_3(%arg0: i32, %arg1: i32) -> (i32, i32, i32) {
    %c0_i32 = arith.constant 0 : i32
    %c0_i32_0 = arith.constant 0 : i32
    %c0_i32_1 = arith.constant 0 : i32
    return %arg0, %c0_i32, %c0_i32_0 : i32, i32, i32
  }
}

</mosaic_0001>

<bundles_post_ra>
// kernel: tpu_custom_call.1
= control target key start
LH: loop header
LB: loop body
LE: loop exit
PB: predicated region body
PF: predicated region fallthrough
CT: control target
= control target key end

     0   :  { %s966_s0 = inlined_call_operand.hbm [shape: f32[6,256], index: 0, kind: input, shape index: {}]   ;;  %s967_s1 = inlined_call_operand.hbm [shape: f32[6,256], index: 1, kind: input, shape index: {}]   ;;  %s968_s2 = inlined_call_operand.hbm [shape: f32[3,512], index: 2, kind: input, shape index: {}]   ;;  %s969_s3 = inlined_call_operand.vmem [shape: f32[2,1,1], index: 3, kind: output, shape index: {}]  }
   0x1   :  { %971 = sst [smem:[#allocation10_spill]] %s968_s2 }
   0x2   :  { %8 = vsyncpa [#allocation3], 0 }
   0x3   :  { %10 = vsyncpa [#allocation3 + $0x1], 0 }
   0x4   :  { %11 = vsyncpa [#allocation5], 0 }
   0x5   :  { %13 = vsyncpa [#allocation5 + $0x1], 0  ;;  %s795_s12 = smov 0   ;;  %s797_s13 = smov 0  }
   0x6   :  { %s799_s14 = smov 0   ;;  %s801_s15 = smov 0  }
   0x7   :  { %s803_s16 = smov 0   ;;  %s805_s17 = smov 0  }
   0x8 LB: > { %s970_s18 = sadd.s32 4294967295, %s771_s17   ;;  %p53_p0 = scmp.ne.s32.totalorder %s755_s13, %s751_s12  ;;  %s771_s17 = sphi %s805_s17, %s19_s17   ;;  %s767_s16 = sphi %s803_s16, %s982_s16   ;;  %s763_s15 = sphi %s801_s15, %s981_s15   ;;  %s759_s14 = sphi %s799_s14, %s980_s14   ;;  %s755_s13 = sphi %s797_s13, %s979_s13   ;;  %s751_s12 = sphi %s795_s12, %s978_s12  }
   0x9   : > { %p827_p1 = scmp.eq.s32.totalorder %s970_s18, 0  ;;  %p538_p2 = scmp.ge.s32.totalorder %s771_s17, 1 }
   0xa   : > { %p139_p3 = scmp.lt.s32.totalorder %s771_s17, 3  ;;  %s974_s2 = sld [smem:[#allocation10_spill]] }
   0xb   : > { %p835_p4 = por %p827_p1, %p53_p0  ;;  %s773_s25 = smov [#allocation6]  }
   0xc   : > { %p842_p5 = pnand %p538_p2, %p139_p3  ;;  %s153_s26 = sshll.u32 %s773_s25, 4  ;;  %s154_s26 = int_to_ptr.vmem [resolvable:$true] %s153_s26 }
   0xd   : > { %s31_s27 = sadd.s32 1, %s767_s16  ;;  %s40_s28 = sadd.s32 1, %s759_s14 }
   0xe   : > { %p559_p6 = pneg %p842_p5  ;;  %p33_p8 = scmp.ge.s32.totalorder %s31_s27, 2 }
   0xf   : > { %p47_p9 = scmp.ne.s32.totalorder %s759_s14, %s755_s13  ;;  %p48_p10 = scmp.eq.s32.totalorder %s771_s17, 0 }
  0x10   : > { %s151_s23 = sshll.u32 %s974_s2, 4  ;;  %p560_p7 = pnand %p559_p6, %p827_p1  ;;  %s152_s23 = int_to_ptr.hbm [resolvable:$true] %s151_s23 }
  0x11   : > { %s984_s27 = smov (%p33_p8, %s31_s27), 0  ;;  %p857_p11 = por %p48_p10, %p47_p9 }
  0x12   : > { %562 = dma.hbm_to_vmem [thread:$0]  (!%p560_p7), %s152_s23, 256, %s154_s26, [#allocation5]  }
  0x13   : > { %p571_p12 = scmp.lt.s32.totalorder %s771_s17, 2  ;;  %s37_s30 = ssub.s32 %s767_s16, %s984_s27 }
  0x14   : > { %s164_s4 = sand.u32 1, %s759_s14   ;;  %p38_p13 = scmp.eq.s32.totalorder %s37_s30, 0 }
  0x15   : > { %s541_s5 = sshll.u32 %s164_s4, 3  ;;  %s542_s6 = sshll.u32 %s767_s16, 3 }
  0x16   : > { %s867_s7 = scalar_select %p38_p13, %s759_s14, %s40_s28  }
  0x17   : > { %s173_s10 = scalar_lea.hbm %s966_s0, %s542_s6  ;;  %s168_s12 = scalar_lea.vmem [#allocation2], %s541_s5 }
  0x18   : > { %s175_s11 = sshll.u32 %s173_s10, 4  ;;  %s177_s21 = sshll.u32 %s168_s12, 4  ;;  %s176_s11 = int_to_ptr.hbm [resolvable:$true] %s175_s11  ;;  %s178_s21 = int_to_ptr.vmem [resolvable:$true] %s177_s21 }
  0x19   : > { %p564_p0 = pnand %p571_p12, %p857_p11  ;;  %s193_s25 = scalar_lea.hbm %s967_s1, %s542_s6 }
  0x1a   : > { %s184_s26 = sand.u32 1, %s771_s17   ;;  %s165_s30 = scalar_lea.sflag [#allocation3], %s164_s4 }
  0x1b   : > { %566 = dma.hbm_to_vmem [thread:$0]  (!%p564_p0), %s176_s11, 128, %s178_s21, %s165_s30  }
  0x1c   : > { %s195_s28 = sshll.u32 %s193_s25, 4  ;;  %s188_s18 = scalar_lea.vmem [#allocation4], %s541_s5  ;;  %s196_s28 = int_to_ptr.hbm [resolvable:$true] %s195_s28 }
  0x1d   : > { %s197_s2 = sshll.u32 %s188_s18, 4  ;;  %s185_s8 = scalar_lea.sflag [#allocation5], %s184_s26  ;;  %s198_s2 = int_to_ptr.vmem [resolvable:$true] %s197_s2 }
  0x1e   : > { %569 = dma.hbm_to_vmem [thread:$0]  (!%p564_p0), %s196_s28, 128, %s198_s2, %s185_s8  }
  0x1f   : > { %206 = sbr.rel (%p842_p5) target bundleno = 310 (0x136), region = 32  ;;  %s208_s29 = sand.u32 (!%p842_p5), 1, %s755_s13  }
  0x20   : > { %s883_s9 = sshll.u32 (!%p842_p5), %s208_s29, 3  ;;  %s209_s6 = scalar_lea.sflag (!%p842_p5), [#allocation3], %s208_s29 }
  0x21   : > { %s212_s10 = scalar_lea.vmem (!%p842_p5), [#allocation2], %s883_s9 }
  0x24   : > { %738 = dma.done.wait (%p835_p4), %s209_s6, 128  }
  0x25   : > { %740 = vsyncadd (%p835_p4), %s209_s6, 4294967168  ;;  %s977_s18 = sadd.s32 4294967295, %s771_s17   ;;  %s222_s4 = scalar_lea.vmem [#allocation4], %s883_s9 }
  0x26   : > { %s218_s2 = sand.u32 1, %s977_s18  }
  0x27   : > { %s219_s24 = scalar_lea.sflag [#allocation5], %s218_s2 }
  0x28   : > { %742 = dma.done.wait (%p835_p4), %s219_s24, 128  }
  0x29   : > { %744 = vsyncadd (%p835_p4), %s219_s24, 4294967168 }
  0x2a   : > { %746 = dma.done.wait (%p827_p1), [#allocation5], 256  }
  0x2b   : > { %748 = vsyncadd (%p827_p1), [#allocation5], 4294967040  ;;  %v265_v0 = vld [vmem:[#allocation6] ss:$4 sm:$0xf]  ;;  %vm280_vm0 = vcmask 1040384  }
  0x2c   : > { %v267_v1 = vld [vmem:[#allocation6 + $0x1] ss:$4 sm:$0xf]  ;;  %v270_v3 = vmul.f32 %v265_v0, %v265_v0  ;;  %v269_v4 = vld [vmem:[#allocation6 + $0x2] ss:$4 sm:$0xf] }
  0x2d   : > { %v290_v2 = vmul.f32 %v267_v1, %v265_v0  ;;  %v347_v5 = vmul.f32 %v269_v4, %v267_v1  ;;  %v309_v6 = vmul.f32 %v269_v4, %v265_v0  ;;  %v328_v7 = vmul.f32 %v267_v1, %v267_v1  ;;  %p256_p1 = scmp.lt.s32.totalorder %s763_s15, 1 }
  0x2e   : > { %v901_v8 = vmul.f32 %v269_v4, %v269_v4  ;;  %v272_v13 = vperm.slane %v270_v3, 0  ;;  %v273_v14 = vperm.slane %v270_v3, 1  ;;  %v274_v15 = vperm.slane %v270_v3, 2 }
  0x2f   : > { %v292_v9 = vperm.slane %v290_v2, 0  ;;  %v293_v10 = vperm.slane %v290_v2, 1  ;;  %v294_v11 = vperm.slane %v290_v2, 2  ;;  %v295_v12 = vperm.slane %v290_v2, 3  ;;  %s986_s15 = smov (!%p256_p1, %s763_s15), 1 }
  0x30   : > { %v275_v16 = vperm.slane %v270_v3, 3  ;;  %v281_v22 = vsel %vm280_vm0, %v272_v13, 0.0  ;;  %v282_v23 = vsel %vm280_vm0, %v273_v14, 0.0  ;;  %v284_v24 = vsel %vm280_vm0, %v274_v15, 0.0  ;;  %s940_s5 = scalar_lea.vmem %s969_s3, %s986_s15 }
  0x31   : > { %v300_v17 = vsel %vm280_vm0, %v292_v9, 0.0  ;;  %v301_v18 = vsel %vm280_vm0, %v293_v10, 0.0  ;;  %v303_v19 = vsel %vm280_vm0, %v294_v11, 0.0  ;;  %v305_v20 = vsel %vm280_vm0, %v295_v12, 0.0  ;;  %v386_v12 = vld [vmem:[%s222_s4] sm:$0x3f] }
  0x32   : > { %v302_v21 = vadd.f32 %v301_v18, %v300_v17  ;;  %v283_v25 = vadd.f32 %v282_v23, %v281_v22  ;;  %v286_v26 = vsel %vm280_vm0, %v275_v16, 0.0  ;;  %v349_v27 = vperm.slane %v347_v5, 0 }
  0x33   : > { %v350_v28 = vperm.slane %v347_v5, 1  ;;  %v351_v30 = vperm.slane %v347_v5, 2  ;;  %v352_v31 = vperm.slane %v347_v5, 3  ;;  %v311_v32 = vperm.slane %v309_v6, 0 }
  0x34   : > { %v304_v29 = vadd.f32 %v303_v19, %v302_v21  ;;  %v285_v33 = vadd.f32 %v284_v24, %v283_v25  ;;  %v357_v34 = vsel %vm280_vm0, %v349_v27, 0.0  ;;  %v312_v36 = vperm.slane %v309_v6, 1 }
  0x35   : > { %v358_v35 = vsel %vm280_vm0, %v350_v28, 0.0  ;;  %v360_v39 = vsel %vm280_vm0, %v351_v30, 0.0  ;;  %v362_v40 = vsel %vm280_vm0, %v352_v31, 0.0  ;;  %v313_v42 = vperm.slane %v309_v6, 2 }
  0x36   : > { %v306_v37 = vadd.f32 %v305_v20, %v304_v29  ;;  %v359_v38 = vadd.f32 %v358_v35, %v357_v34  ;;  %v287_v41 = vadd.f32 %v286_v26, %v285_v33  ;;  %v314_v43 = vperm.slane %v309_v6, 3 }
  0x37   : > { %v319_v44 = vsel %vm280_vm0, %v311_v32, 0.0  ;;  %v320_v46 = vsel %vm280_vm0, %v312_v36, 0.0  ;;  %v330_v47 = vperm.slane %v328_v7, 0  ;;  %v331_v48 = vperm.slane %v328_v7, 1 }
  0x38   : > { %307 = vadd.xlane.f32.xlu0 %v306_v37  ;;  %v361_v45 = vadd.f32 %v360_v39, %v359_v38  ;;  %288 = vadd.xlane.f32.xlu1 %v287_v41  ;;  %v321_v49 = vadd.f32 %v320_v46, %v319_v44  ;;  %v322_v50 = vsel %vm280_vm0, %v313_v42, 0.0  ;;  %v324_v51 = vsel %vm280_vm0, %v314_v43, 0.0 }
  0x39   : > { %v332_v52 = vperm.slane %v328_v7, 2  ;;  %v333_v54 = vperm.slane %v328_v7, 3  ;;  %v338_v55 = vsel %vm280_vm0, %v330_v47, 0.0  ;;  %v339_v56 = vsel %vm280_vm0, %v331_v48, 0.0 }
  0x3a   : > { %v363_v53 = vadd.f32 %v362_v40, %v361_v45  ;;  %v323_v57 = vadd.f32 %v322_v50, %v321_v49  ;;  %v340_v58 = vadd.f32 %v339_v56, %v338_v55  ;;  %v368_v60 = vperm.slane %v901_v8, 0 }
  0x3b   : > { %v341_v59 = vsel %vm280_vm0, %v332_v52, 0.0  ;;  %v343_v61 = vsel %vm280_vm0, %v333_v54, 0.0  ;;  %v369_v62 = vperm.slane %v901_v8, 1  ;;  %v370_v63 = vperm.slane %v901_v8, 2 }
  0x3c   : > { %364 = vadd.xlane.f32.xlu2 %v363_v53  ;;  %v371_v0 = vperm.slane %v901_v8, 3  ;;  %v325_v1 = vadd.f32 %v324_v51, %v323_v57  ;;  %v342_v2 = vadd.f32 %v341_v59, %v340_v58  ;;  %v376_v3 = vsel %vm280_vm0, %v368_v60, 0.0  ;;  %v385_v8 = vld [vmem:[%s212_s10] sm:$0x3f] }
  0x3d   : > { %v377_v4 = vsel %vm280_vm0, %v369_v62, 0.0  ;;  %v379_v5 = vsel %vm280_vm0, %v370_v63, 0.0  ;;  %v387_v13 = vsub.f32 %v385_v8, %v386_v12  ;;  %vm263_vm1 = vcmask 0  }
  0x3e   : > { %v344_v6 = vadd.f32 %v343_v61, %v342_v2  ;;  %v378_v7 = vadd.f32 %v377_v4, %v376_v3  ;;  %v381_v9 = vsel %vm280_vm0, %v371_v0, 0.0  ;;  %v774_v14 = vmov 0.0  }
  0x3f   : > { %264 = vst.msk [vmem:[%s940_s5] sm:$0x1] %vm263_vm1, %v774_v14  ;;  %v404_v15 = vrot.slane %v387_v13, 1  ;;  %v412_v16 = vrot.slane %v387_v13, 2  ;;  %v388_v17 = vmul.f32 %v387_v13, %v387_v13 }
  0x40   : > { %326 = vadd.xlane.f32.xlu0 %v325_v1  ;;  %345 = vadd.xlane.f32.xlu1 %v344_v6  ;;  %v380_v10 = vadd.f32 %v379_v5, %v378_v7 }
  0x41   : > { %v406_v18 = vmul.f32 %v404_v15, %v387_v13  ;;  %v414_v19 = vmul.f32 %v412_v16, %v387_v13  ;;  %v390_v21 = vrot.slane %v388_v17, 3 }
  0x42   : > { %v382_v11 = vadd.f32 %v381_v9, %v380_v10 }
  0x43   : > { %v408_v22 = vrot.slane %v406_v18, 3  ;;  %v416_v24 = vrot.slane %v414_v19, 3  ;;  %v392_v25 = vadd.f32 %v390_v21, %v388_v17 }
  0x44   : > { %383 = vadd.xlane.f32.xlu2 %v382_v11 }
  0x45   : > { %v410_v27 = vadd.f32 %v408_v22, %v406_v18  ;;  %v418_v28 = vadd.f32 %v416_v24, %v414_v19  ;;  %v395_v29 = vrot.slane %v392_v25, 1  ;;  %v399_v37 = vrot.slane %v392_v25, 2 }
  0x46   : > { %v428_v48 = vld [vmem:[%s940_s5] sm:$0x1] }
  0x47   : > { %v422_v30 = vrot.slane %v410_v27, 1 }
  0xab   : > { %v308_v20 = vpop.xlane.xlu0 %307  ;;  %v289_v23 = vpop.xlane.xlu1 %288 }
  0xac   : > { %v411_v32 = vmul.f32 %v410_v27, %v308_v20  ;;  %v393_v35 = vmul.f32 %v392_v25, %v289_v23 }
  0xaf   : > { %v365_v26 = vpop.xlane.xlu2 %364 }
  0xb0   : > { %v424_v38 = vmul.f32 %v422_v30, %v365_v26 }
  0xb3   : > { %v327_v31 = vpop.xlane.xlu0 %326  ;;  %v346_v34 = vpop.xlane.xlu1 %345 }
  0xb4   : > { %v419_v33 = vmul.f32 %v418_v28, %v327_v31  ;;  %v397_v36 = vmul.f32 %v395_v29, %v346_v34 }
  0xb6   : > { %v420_v39 = vadd.f32 %v419_v33, %v411_v32  ;;  %v398_v40 = vadd.f32 %v397_v36, %v393_v35 }
  0xb7   : > { %v384_v42 = vpop.xlane.xlu2 %383 }
  0xb8   : > { %v425_v41 = vadd.f32 %v424_v38, %v420_v39  ;;  %v401_v43 = vmul.f32 %v399_v37, %v384_v42 }
  0xba   : > { %v426_v44 = vmul.f32 2.0, %v425_v41  ;;  %v402_v45 = vadd.f32 %v401_v43, %v398_v40 }
  0xbc   : > { %v427_v46 = vadd.f32 %v426_v44, %v402_v45 }
  0xbe   : > { %v429_v47 = vsel %vm280_vm0, %v427_v46, 0.0 }
  0xbf   : > { %430 = vadd.xlane.f32.xlu0 %v429_v47 }
 0x132   : > { %v431_v49 = vpop.xlane.xlu0 %430 }
 0x133   : > { %v432_v50 = vadd.f32 %v431_v49, %v428_v48 }
 0x135   : > { %434 = vst.msk [vmem:[%s940_s5] sm:$0x1] %vm263_vm1, %v432_v50 }
 0x136 PF: > { %s19_s17 = sadd.s32 1, %s771_s17   ;;  %s978_s12 = smov %s755_s13 }
 0x137   : > { %p16_p2 = scmp.ge.s32.totalorder %s19_s17, 4   ;;  %s979_s13 = smov %s759_s14 }
 0x138   : > { %s980_s14 = smov %s867_s7  ;;  %s981_s15 = smov %s767_s16 }
 0x139   : > { %s982_s16 = smov %s984_s27  ;;  %18 = sbr.rel (!%p16_p2) target bundleno = 8 (0x8), region = 95 }
 0x13e   :  { %452 = vsyncpa [#allocation3], 1 }
 0x13f   :  { %454 = vsyncpa [#allocation3 + $0x1], 1 }
 0x140   :  { %455 = vsyncpa [#allocation5], 1 }
 0x141   :  { %457 = vsyncpa [#allocation5 + $0x1], 1 }

</bundles_post_ra>
